<compile_context>
chip_gen: v5e
topology: v5e:2x2
jax: 0.10.0
libtpu: 0.0.40
codegen_flags: <defaults>
</compile_context>

<pallas_src>
import functools

import jax
import jax.numpy as jnp
from jax.experimental import pallas as pl
from jax.experimental.pallas import tpu as pltpu

LANE = 128   # lane width
SUB = 8      # sublane width
H1, H2 = 32, 64  # BCModel hidden sizes


def _round_up(n, m):
    return ((n + m - 1) // m) * m


def bc_mlp_kernel(x_ref, p_ref, o_ref, *, d, in_size, out_size):
    """One batch tile of the full 3-layer MLP.

    x_ref: (TB, in_size)       native-width activations for this batch tile
    p_ref: (3*d + 3*SUB, d)    packed [W1; W2; W3; b1; b2; b3] (zero padded)
    o_ref: (TB, out_size)      narrow output tile
    """
    prec = jax.lax.Precision.HIGHEST
    x = x_ref[...]
    # Static, sublane-aligned slices of the resident packed-parameter tile.
    w1 = p_ref[pl.ds(0, in_size), :]            # (in_size, d); cols >= 32 are 0
    w2 = p_ref[pl.ds(d, d), :]                  # (d, d); only [:32, :64] nonzero
    w3 = p_ref[pl.ds(2 * d, d), :]              # (d, d); only [:64, :out] nonzero
    b1 = p_ref[pl.ds(3 * d, 1), :]
    b2 = p_ref[pl.ds(3 * d + SUB, 1), :]
    b3 = p_ref[pl.ds(3 * d + 2 * SUB, 1), :]

    h1 = jnp.tanh(jnp.dot(x, w1, preferred_element_type=jnp.float32, precision=prec) + b1)
    h2 = jnp.tanh(jnp.dot(h1, w2, preferred_element_type=jnp.float32, precision=prec) + b2)
    out = jnp.dot(h2, w3, preferred_element_type=jnp.float32, precision=prec) + b3
    # Padded lanes are exactly 0 (zero weights/bias, tanh(0)=0); only the real
    # output columns are stored -> lane-narrow masked store, minimal writeback.
    o_ref[...] = out[:, :out_size].astype(o_ref.dtype)


def pack_params(params, input_size, output_size):
    """Pack once at init: zero-pad every weight to a common (D, D) tile and
    every bias into the first row of an 8-row block; concatenate into a single
    [3D + 24, D] buffer that stays device-resident across forward calls.

    Zero padding is exact: padded weight columns and bias lanes are 0, so
    tanh(0) = 0 propagates zeros through padded lanes.
    """
    d = max(_round_up(s, LANE) for s in (input_size, H1, H2, output_size))

    def pad_w(w):
        return jnp.zeros((d, d), jnp.float32).at[: w.shape[0], : w.shape[1]].set(w)

    def pad_b(b):
        return jnp.zeros((SUB, d), jnp.float32).at[0, : b.shape[0]].set(b)

    packed = jnp.concatenate(
        [
            pad_w(params["w1"]),
            pad_w(params["w2"]),
            pad_w(params["w3"]),
            pad_b(params["b1"]),
            pad_b(params["b2"]),
            pad_b(params["b3"]),
        ],
        axis=0,
    )
    return packed, d


def bc_model_forward(x, packed, *, d, out_size, tile_rows=1024):
    """x: [B, in_size] f32 (native width).  packed: pre-packed param buffer."""
    B, in_size = x.shape

    # Batch tile: multiple of 8 sublanes, capped at ceil(B/2) so the grid has
    # at least 2 steps whenever B > 8 (megacore sharding on v7x).
    tb = max(SUB, min(_round_up(tile_rows, SUB), _round_up(-(-B // 2), SUB)))
    grid = (pl.cdiv(B, tb),)

    return pl.pallas_call(
        functools.partial(bc_mlp_kernel, d=d, in_size=in_size, out_size=out_size),
        out_shape=jax.ShapeDtypeStruct((B, out_size), jnp.float32),
        grid=grid,
        in_specs=[
            # Batch tile of native-width activations, pipelined over the grid.
            # Partial last block is handled by Pallas (no wrapper-side padding).
            pl.BlockSpec((tb, in_size), lambda i: (i, 0)),
            # Packed params: constant index_map -> DMA'd once, stays resident.
            pl.BlockSpec(packed.shape, lambda i: (0, 0)),
        ],
        out_specs=pl.BlockSpec((tb, out_size), lambda i: (i, 0)),
        compiler_params=pltpu.CompilerParams(
            dimension_semantics=("parallel",),
            vmem_limit_bytes=32 * 1024 * 1024,
        ),
    )(x, packed)


def init_params(key, input_size, output_size):
    """Deterministic synthetic parameters matching BCModel's layer shapes.

    Weights stored as [fan_in, fan_out] so y = x @ W + b (== PyTorch x @ W.T + b).
    """
    ks = jax.random.split(key, 6)

    def lin(kw, kb, fan_in, fan_out):
        bound = 1.0 / jnp.sqrt(fan_in)  # PyTorch default Linear init range
        w = jax.random.uniform(kw, (fan_in, fan_out), jnp.float32, -bound, bound)
        b = jax.random.uniform(kb, (fan_out,), jnp.float32, -bound, bound)
        return w, b

    w1, b1 = lin(ks[0], ks[1], input_size, H1)
    w2, b2 = lin(ks[2], ks[3], H1, H2)
    w3, b3 = lin(ks[4], ks[5], H2, output_size)
    return {"w1": w1, "b1": b1, "w2": w2, "b2": b2, "w3": w3, "b3": b3}


def _reference(x, params):
    prec = jax.lax.Precision.HIGHEST
    h = jnp.tanh(jnp.dot(x, params["w1"], precision=prec) + params["b1"])
    h = jnp.tanh(jnp.dot(h, params["w2"], precision=prec) + params["b2"])
    return jnp.dot(h, params["w3"], precision=prec) + params["b3"]


if __name__ == "__main__":
    key = jax.random.PRNGKey(0)
    k_x, k_x2, k_p = jax.random.split(key, 3)

    input_size = 16
    output_size = 4
    params = init_params(k_p, input_size, output_size)

    # Pack once at init; the packed buffer is reused across every forward call.
    packed, d = pack_params(params, input_size, output_size)
    packed = jax.block_until_ready(packed)

    # Small batch (single grid step, partial block smaller than a full tile).
    x = jax.random.normal(k_x, (8, input_size), dtype=jnp.float32)
    out = bc_model_forward(x, packed, d=d, out_size=output_size)
    jax.block_until_ready(out)
    ref = _reference(x, params)
    assert out.shape == (8, output_size)
    assert jnp.allclose(out, ref, atol=1e-5, rtol=1e-5)

    # Non-multiple batch with a multi-step grid (exercises tiling + the
    # masked partial last block).
    x2 = jax.random.normal(k_x2, (37, input_size), dtype=jnp.float32)
    out2 = bc_model_forward(x2, packed, d=d, out_size=output_size, tile_rows=16)
    jax.block_until_ready(out2)
    ref2 = _reference(x2, params)
    assert out2.shape == (37, output_size)
    assert jnp.allclose(out2, ref2, atol=1e-5, rtol=1e-5)

    print("KERNEL_OK")
</pallas_src>

<mosaic_0001>
module attributes {stable_mosaic.version = 11 : i64} {
  func.func @bc_mlp_kernel(%arg0: i32, %arg1: memref<8x16xf32, #tpu.memory_space<vmem>>, %arg2: memref<408x128xf32, #tpu.memory_space<vmem>>, %arg3: memref<8x4xf32, #tpu.memory_space<vmem>>) attributes {dimension_semantics = [#tpu.dimension_semantics<parallel>], iteration_bounds = array<i64: 1>, scalar_prefetch = 0 : i64, scratch_operands = 0 : i64, tpu.core_type = #tpu.core_type<tc>, window_params = [{transform_indices = @transform_0, window_bounds = array<i64: 8, 16>}, {pipeline_mode = #tpu.pipeline_mode<synchronous>, transform_indices = @transform_1, window_bounds = array<i64: 408, 128>}, {transform_indices = @transform_2, window_bounds = array<i64: 8, 4>}]} {
    %c0 = arith.constant 0 : index
    %c0_0 = arith.constant 0 : index
    %0 = vector.load %arg1[%c0, %c0_0] : memref<8x16xf32, #tpu.memory_space<vmem>>, vector<8x16xf32>
    %c0_1 = arith.constant 0 : index
    %c0_2 = arith.constant 0 : index
    %1 = vector.load %arg2[%c0_1, %c0_2] : memref<408x128xf32, #tpu.memory_space<vmem>>, vector<16x128xf32>
    %c128 = arith.constant 128 : index
    %c0_3 = arith.constant 0 : index
    %2 = vector.load %arg2[%c128, %c0_3] : memref<408x128xf32, #tpu.memory_space<vmem>>, vector<128x128xf32>
    %c256 = arith.constant 256 : index
    %c0_4 = arith.constant 0 : index
    %3 = vector.load %arg2[%c256, %c0_4] : memref<408x128xf32, #tpu.memory_space<vmem>>, vector<128x128xf32>
    %c384 = arith.constant 384 : index
    %c0_5 = arith.constant 0 : index
    %4 = vector.load %arg2[%c384, %c0_5] : memref<408x128xf32, #tpu.memory_space<vmem>>, vector<1x128xf32>
    %c392 = arith.constant 392 : index
    %c0_6 = arith.constant 0 : index
    %5 = vector.load %arg2[%c392, %c0_6] : memref<408x128xf32, #tpu.memory_space<vmem>>, vector<1x128xf32>
    %c400 = arith.constant 400 : index
    %c0_7 = arith.constant 0 : index
    %6 = vector.load %arg2[%c400, %c0_7] : memref<408x128xf32, #tpu.memory_space<vmem>>, vector<1x128xf32>
    %cst = arith.constant dense<0.000000e+00> : vector<8x128xf32>
    %7 = tpu.matmul %0, %1, %cst {dimension_numbers = #tpu.dot_dimension_numbers<[1], [0], [0], [1], [0, 0, 1, 1], [], []>, precision = #tpu.contract_precision<fp32>} : vector<8x16xf32>, vector<16x128xf32>, vector<8x128xf32> -> vector<8x128xf32>
    %8 = vector.broadcast %4 : vector<1x128xf32> to vector<8x128xf32>
    %9 = arith.addf %7, %8 : vector<8x128xf32>
    %10 = math.tanh %9 : vector<8x128xf32>
    %cst_8 = arith.constant dense<0.000000e+00> : vector<8x128xf32>
    %11 = tpu.matmul %10, %2, %cst_8 {dimension_numbers = #tpu.dot_dimension_numbers<[1], [0], [0], [1], [0, 0, 1, 1], [], []>, precision = #tpu.contract_precision<fp32>} : vector<8x128xf32>, vector<128x128xf32>, vector<8x128xf32> -> vector<8x128xf32>
    %12 = vector.broadcast %5 : vector<1x128xf32> to vector<8x128xf32>
    %13 = arith.addf %11, %12 : vector<8x128xf32>
    %14 = math.tanh %13 : vector<8x128xf32>
    %cst_9 = arith.constant dense<0.000000e+00> : vector<8x128xf32>
    %15 = tpu.matmul %14, %3, %cst_9 {dimension_numbers = #tpu.dot_dimension_numbers<[1], [0], [0], [1], [0, 0, 1, 1], [], []>, precision = #tpu.contract_precision<fp32>} : vector<8x128xf32>, vector<128x128xf32>, vector<8x128xf32> -> vector<8x128xf32>
    %16 = vector.broadcast %6 : vector<1x128xf32> to vector<8x128xf32>
    %17 = arith.addf %15, %16 : vector<8x128xf32>
    %18 = vector.extract_strided_slice %17 {offsets = [0, 0], sizes = [8, 4], strides = [1, 1]} : vector<8x128xf32> to vector<8x4xf32>
    %c0_10 = arith.constant 0 : index
    %c0_11 = arith.constant 0 : index
    %19 = vector.load %arg3[%c0_10, %c0_11] : memref<8x4xf32, #tpu.memory_space<vmem>>, vector<8x4xf32>
    tpu.vector_store %arg3[%c0_10, %c0_11], %18 {strides = array<i32>} : memref<8x4xf32, #tpu.memory_space<vmem>>, vector<8x4xf32>,
    return
  }
  func.func @transform_0(%arg0: i32) -> (i32, i32) {
    %c0_i32 = arith.constant 0 : i32
    %c0_i32_0 = arith.constant 0 : i32
    return %arg0, %c0_i32 : i32, i32
  }
  func.func @transform_1(%arg0: i32) -> (i32, i32) {
    %c0_i32 = arith.constant 0 : i32
    %c0_i32_0 = arith.constant 0 : i32
    %c0_i32_1 = arith.constant 0 : i32
    return %c0_i32, %c0_i32_0 : i32, i32
  }
  func.func @transform_2(%arg0: i32) -> (i32, i32) {
    %c0_i32 = arith.constant 0 : i32
    %c0_i32_0 = arith.constant 0 : i32
    return %arg0, %c0_i32 : i32, i32
  }
}

</mosaic_0001>

<bundles_post_ra>
// kernel: tpu_custom_call.1
= control target key start
LH: loop header
LB: loop body
LE: loop exit
PB: predicated region body
PF: predicated region fallthrough
CT: control target
= control target key end

     0   :  { %7 = vsyncpa [#allocation3], 0  ;;  %s1479_s0 = inlined_call_operand.hbm [shape: f32[8,16], index: 0, kind: input, shape index: {}]   ;;  %s1480_s1 = inlined_call_operand.hbm [shape: f32[408,128], index: 1, kind: input, shape index: {}]   ;;  %s1481_s2 = inlined_call_operand.vmem [shape: f32[8,4], index: 2, kind: output, shape index: {}]  }
   0x1   :  { %s14_s11 = sshll.u32 %s1479_s0, 4  ;;  %s15_s11 = int_to_ptr.hbm [resolvable:$true] %s14_s11 }
   0x2   :  { %8 = vsyncpa [#allocation5], 0  ;;  %s1000_s12 = smov [#allocation2]   ;;  %s24_s16 = sshll.u32 %s1480_s1, 4  ;;  %s25_s16 = int_to_ptr.hbm [resolvable:$true] %s24_s16 }
   0x3   :  { %s16_s13 = sshll.u32 %s1000_s12, 4  ;;  %s1001_s17 = smov [#allocation4]   ;;  %s17_s13 = int_to_ptr.vmem [resolvable:$true] %s16_s13 }
   0x4   :  { %19 = dma.hbm_to_vmem [thread:$0]  %s15_s11, 128, %s17_s13, [#allocation3]  }
   0x5   :  { %s26_s18 = sshll.u32 %s1001_s17, 4  ;;  %s1002_s19 = smov 128   ;;  %s27_s18 = int_to_ptr.vmem [resolvable:$true] %s26_s18 }
   0x6   :  { %s1003_s20 = smov 8  }
   0x7   :  { %32 = dma.hbm_to_vmem [thread:$0]  %s25_s16, 6528, %s27_s18, [#allocation5], %s1002_s19, %s1002_s19, %s1003_s20  }
   0x8   :  { %996 = dma.done.wait [#allocation3], 128  }
   0x9   :  { %997 = vsyncadd [#allocation3], 4294967168 }
   0xa   :  { %998 = dma.done.wait [#allocation5], 6528  }
   0xb   :  { %999 = vsyncadd [#allocation5], 4294960768  ;;  %vm80_vm0 = vcmask 130048   ;;  %v43_v0 = vld [vmem:[#allocation4 + $0x8] sm:$0xff]  ;;  %v42_v1 = vld [vmem:[#allocation4] sm:$0xff]  ;;  %vm929_vm1 = vcmask 31744  }
   0xc   :  { %v41_v2 = vld [vmem:[#allocation2] sm:$0xff]  ;;  %v1025_v3 = vand.u32 4294901760, %v43_v0  ;;  %v1027_v4 = vand.u32 4294901760, %v42_v1  ;;  %v58_v7 = vld [vmem:[#allocation4 + $0xf0] sm:$0xff]  ;;  %v57_v8 = vld [vmem:[#allocation4 + $0xe8] sm:$0xff] }
   0xd   :  { %v82_v5 = vsel %vm80_vm0, %v41_v2, 0  ;;  %v59_v6 = vld [vmem:[#allocation4 + $0xf8] sm:$0xff]  ;;  %v1033_v11 = vand.u32 4294901760, %v58_v7  ;;  %v1035_v12 = vand.u32 4294901760, %v57_v8  ;;  %v56_v13 = vld [vmem:[#allocation4 + $0xe0] sm:$0xff]  ;;  %v54_v27 = vld [vmem:[#allocation4 + $0xd0] sm:$0xff] }
   0xe   :  { %v1029_v9 = vand.u32 4294901760, %v82_v5  ;;  %v1031_v10 = vand.u32 4294901760, %v59_v6  ;;  %v55_v14 = vld [vmem:[#allocation4 + $0xd8] sm:$0xff]  ;;  %v126_v15 = vsub.f32 %v43_v0, %v1025_v3  ;;  %99 = vmatpush.msra.mxu0 %v1025_v3  ;;  %v132_v16 = vsub.f32 %v42_v1, %v1027_v4  ;;  %183 = vmatpush.msra.mxu3 %v1025_v3  ;;  %v53_v40 = vld [vmem:[#allocation4 + $0xc8] sm:$0xff]  ;;  %v52_v44 = vld [vmem:[#allocation4 + $0xc0] sm:$0xff] }
   0xf   :  { %v1041_v17 = vand.u32 4294901760, %v56_v13  ;;  %v1043_v18 = vand.u32 4294901760, %v55_v14  ;;  %v1050_v21 = vsub.f32 %v58_v7, %v1033_v11  ;;  %v1053_v22 = vsub.f32 %v57_v8, %v1035_v12  ;;  %v51_v45 = vld [vmem:[#allocation4 + $0xb8] sm:$0xff]  ;;  %v50_v46 = vld [vmem:[#allocation4 + $0xb0] sm:$0xff]  ;;  %v49_v51 = vld [vmem:[#allocation4 + $0xa8] sm:$0xff] }
  0x10   :  { %v103_v19 = vsub.f32 %v82_v5, %v1029_v9  ;;  %v1047_v20 = vsub.f32 %v59_v6, %v1031_v10  ;;  %158 = vmatpush.msra.mxu2 %v126_v15  ;;  %101 = vmatpush.msra.mxu0 %v1027_v4  ;;  %v127_v23 = vand.u32 4294901760, %v126_v15  ;;  %v133_v24 = vand.u32 4294901760, %v132_v16  ;;  %v48_v52 = vld [vmem:[#allocation4 + $0xa0] sm:$0xff]  ;;  %v47_v0 = vld [vmem:[#allocation4 + $0x98] sm:$0xff] }
  0x11   :  { %v1057_v25 = vsub.f32 %v56_v13, %v1041_v17  ;;  %v1060_v26 = vsub.f32 %v55_v14, %v1043_v18  ;;  %185 = vmatpush.msra.mxu3 %v1027_v4  ;;  %v294_v30 = vand.u32 4294901760, %v1050_v21  ;;  %v300_v31 = vand.u32 4294901760, %v1053_v22 }
  0x12   :  { %v104_v28 = vand.u32 4294901760, %v103_v19  ;;  %v288_v29 = vand.u32 4294901760, %v1047_v20  ;;  %161 = vmatpush.msra.mxu2 %v132_v16  ;;  %v128_v32 = vsub.f32 %v126_v15, %v127_v23  ;;  %210 = vmatpush.msrb.mxu0 %v127_v23  ;;  %v134_v33 = vsub.f32 %v132_v16, %v133_v24 }
  0x13   :  { %v306_v34 = vand.u32 4294901760, %v1057_v25  ;;  %v312_v35 = vand.u32 4294901760, %v1060_v26  ;;  %164 = vmatmul.f32.vlgmr.msra.gmra.mxu2 %v103_v19  ;;  %v295_v38 = vsub.f32 %v1050_v21, %v294_v30  ;;  %v1074_v39 = vand.u32 4294901760, %v54_v27 }
  0x14   :  { %v105_v36 = vsub.f32 %v103_v19, %v104_v28  ;;  %189 = vmatmul.f32.vlgmr.msra.gmra.mxu3 %v104_v28  ;;  %v289_v37 = vsub.f32 %v1047_v20, %v288_v29  ;;  %v129_v41 = vand.u32 4294901760, %v128_v32  ;;  %v135_v42 = vand.u32 4294901760, %v134_v33  ;;  %214 = vmatpush.msrb.mxu0 %v133_v24 }
  0x15   :  { %v301_v43 = vsub.f32 %v1053_v22, %v300_v31  ;;  %246 = vmatpush.msrb.mxu2 %v1031_v10  ;;  %v296_v49 = vand.u32 4294901760, %v295_v38  ;;  %v307_v50 = vsub.f32 %v1057_v25, %v306_v34  ;;  %v313_v53 = vsub.f32 %v1060_v26, %v312_v35 }
  0x16   :  { %v106_v47 = vand.u32 4294901760, %v105_v36  ;;  %v290_v48 = vand.u32 4294901760, %v289_v37  ;;  %130 = vmatpush.msra.mxu1 %v129_v41  ;;  %v1088_v54 = vsub.f32 %v54_v27, %v1074_v39  ;;  %v1090_v55 = vand.u32 4294901760, %v53_v40  ;;  %v44_v36 = vld [vmem:[#allocation4 + $0x80] sm:$0xff] }
  0x17   :  { %248 = vmatpush.msrb.mxu2 %v1033_v11  ;;  %v302_v56 = vand.u32 4294901760, %v301_v43  ;;  %v1092_v57 = vand.u32 4294901760, %v52_v44  ;;  %v1094_v58 = vand.u32 4294901760, %v51_v45  ;;  %v1096_v59 = vand.u32 4294901760, %v50_v46 }
  0x18   :  { %107 = vmatmul.f32.vlgmr.msra.gmra.mxu0 %v106_v47  ;;  %291 = vmatpush.msrb.mxu3 %v290_v48  ;;  %v318_v60 = vand.u32 4294901760, %v1088_v54  ;;  %v1101_v61 = vsub.f32 %v53_v40, %v1090_v55  ;;  %v1103_v62 = vand.u32 4294901760, %v49_v51  ;;  %v1105_v63 = vand.u32 4294901760, %v48_v52 }
  0x19   :  { %136 = vmatpush.msra.mxu1 %v135_v42  ;;  %250 = vmatpush.msrb.mxu2 %v1035_v12  ;;  %v308_v1 = vand.u32 4294901760, %v307_v50  ;;  %v1109_v2 = vsub.f32 %v52_v44, %v1092_v57  ;;  %v1112_v5 = vsub.f32 %v51_v45, %v1094_v58  ;;  %v1115_v6 = vsub.f32 %v50_v46, %v1096_v59 }
  0x1a   :  { %138 = vmatmul.f32.vlgmr.msra.gmra.mxu1 %v1029_v9  ;;  %297 = vmatpush.msrb.mxu3 %v296_v49  ;;  %v314_v7 = vand.u32 4294901760, %v313_v53  ;;  %v319_v8 = vsub.f32 %v1088_v54, %v318_v60  ;;  %v324_v13 = vand.u32 4294901760, %v1101_v61  ;;  %v1126_v16 = vsub.f32 %v49_v51, %v1103_v62 }
  0x1b   :  { %235 = vmatpush.msrb.mxu1 %v1025_v3  ;;  %252 = vmatpush.msrb.mxu2 %v1041_v17  ;;  %v330_v14 = vand.u32 4294901760, %v1109_v2  ;;  %v336_v15 = vand.u32 4294901760, %v1112_v5  ;;  %v1128_v19 = vand.u32 4294901760, %v47_v0  ;;  %v46_v3 = vld [vmem:[#allocation4 + $0x90] sm:$0xff]  ;;  %v1137_v24 = vsub.f32 %v48_v52, %v1105_v63 }
  0x1c   :  { %303 = vmatpush.msrb.mxu3 %v302_v56  ;;  %389 = vmatpush.msra.mxu0 %v1047_v20  ;;  %v325_v23 = vsub.f32 %v1101_v61, %v324_v13  ;;  %v320_v27 = vand.u32 4294901760, %v319_v8  ;;  %v342_v32 = vand.u32 4294901760, %v1115_v6  ;;  %v1145_v33 = vand.u32 4294901760, %v46_v3 }
  0x1d   :  { %237 = vmatpush.msrb.mxu1 %v1027_v4  ;;  %254 = vmatpush.msrb.mxu2 %v1043_v18  ;;  %v331_v28 = vsub.f32 %v1109_v2, %v330_v14  ;;  %v45_v4 = vld [vmem:[#allocation4 + $0x88] sm:$0xff]  ;;  %v337_v38 = vsub.f32 %v1112_v5, %v336_v15  ;;  %v348_v40 = vand.u32 4294901760, %v1126_v16  ;;  %v1154_v41 = vsub.f32 %v47_v0, %v1128_v19 }
  0x1e   :  { %309 = vmatpush.msrb.mxu3 %v308_v1  ;;  %392 = vmatpush.msra.mxu0 %v1050_v21  ;;  %v326_v37 = vand.u32 4294901760, %v325_v23  ;;  %v354_v42 = vand.u32 4294901760, %v1137_v24  ;;  %v1158_v43 = vand.u32 4294901760, %v45_v4  ;;  %v343_v45 = vsub.f32 %v1115_v6, %v342_v32 }
  0x1f   :  { %256 = vmatpush.msrb.mxu2 %v1074_v39  ;;  %442 = vmatpush.msra.mxu1 %v1031_v10  ;;  %v332_v44 = vand.u32 4294901760, %v331_v28  ;;  %v1166_v46 = vsub.f32 %v46_v3, %v1145_v33  ;;  %v1168_v47 = vand.u32 4294901760, %v44_v36  ;;  %v338_v48 = vand.u32 4294901760, %v337_v38 }
  0x20   :  { %216 = vmatmul.f32.vlgmr.msrb.gmra.mxu0 %v1029_v9  ;;  %315 = vmatpush.msrb.mxu3 %v314_v7  ;;  %v360_v49 = vand.u32 4294901760, %v1154_v41  ;;  %v1177_v50 = vsub.f32 %v45_v4, %v1158_v43  ;;  %v344_v51 = vand.u32 4294901760, %v343_v45  ;;  %v355_v52 = vsub.f32 %v1137_v24, %v354_v42 }
  0x21   :  { %258 = vmatpush.msrb.mxu2 %v1090_v55  ;;  %395 = vmatpush.msra.mxu0 %v1053_v22  ;;  %v366_v53 = vand.u32 4294901760, %v1166_v46  ;;  %v1187_v56 = vsub.f32 %v44_v36, %v1168_v47 }
  0x22   :  { %239 = vmatmul.f32.vlgmr.msrb.gmra.mxu1 %v1029_v9  ;;  %321 = vmatpush.msrb.mxu3 %v320_v27  ;;  %v349_v9 = vsub.f32 %v1126_v16, %v348_v40  ;;  %v361_v1 = vsub.f32 %v1154_v41, %v360_v49  ;;  %v372_v7 = vand.u32 4294901760, %v1177_v50  ;;  %v356_v8 = vand.u32 4294901760, %v355_v52 }
  0x23   :  { %260 = vmatpush.msrb.mxu2 %v1092_v57  ;;  %444 = vmatpush.msra.mxu1 %v1033_v11  ;;  %v367_v3 = vsub.f32 %v1166_v46, %v366_v53  ;;  %v378_v23 = vand.u32 4294901760, %v1187_v56 }
  0x24   :  { %327 = vmatpush.msrb.mxu3 %v326_v37  ;;  %398 = vmatpush.msra.mxu0 %v1057_v25  ;;  %v350_v0 = vand.u32 4294901760, %v349_v9  ;;  %v362_v27 = vand.u32 4294901760, %v361_v1  ;;  %v373_v28 = vsub.f32 %v1177_v50, %v372_v7  ;;  %v75_v25 = vld [vmem:[#allocation4 + $0x178] sm:$0xff]  ;;  %v66_v9 = vld [vmem:[#allocation4 + $0x130] sm:$0xff] }
  0x25   :  { %262 = vmatpush.msrb.mxu2 %v1094_v58  ;;  %446 = vmatpush.msra.mxu1 %v1035_v12  ;;  %v368_v4 = vand.u32 4294901760, %v367_v3  ;;  %v379_v36 = vsub.f32 %v1187_v56, %v378_v23 }
  0x26   :  { %333 = vmatpush.msrb.mxu3 %v332_v44  ;;  %401 = vmatpush.msra.mxu0 %v1060_v26  ;;  %v374_v37 = vand.u32 4294901760, %v373_v28  ;;  %v74_v26 = vld [vmem:[#allocation4 + $0x170] sm:$0xff] }
  0x27   :  { %264 = vmatpush.msrb.mxu2 %v1096_v59  ;;  %448 = vmatpush.msra.mxu1 %v1041_v17  ;;  %v380_v38 = vand.u32 4294901760, %v379_v36 }
  0x28   :  { %339 = vmatpush.msrb.mxu3 %v338_v48  ;;  %404 = vmatpush.msra.mxu0 %v1088_v54  ;;  %v71_v54 = vld [vmem:[#allocation4 + $0x158] sm:$0xff] }
  0x29   :  { %266 = vmatpush.msrb.mxu2 %v1103_v62  ;;  %450 = vmatpush.msra.mxu1 %v1043_v18  ;;  %v67_v48 = vld [vmem:[#allocation4 + $0x138] sm:$0xff] }
  0x2a   :  { %345 = vmatpush.msrb.mxu3 %v344_v51  ;;  %407 = vmatpush.msra.mxu0 %v1101_v61  ;;  %v69_v61 = vld [vmem:[#allocation4 + $0x148] sm:$0xff] }
  0x2b   :  { %268 = vmatpush.msrb.mxu2 %v1105_v63  ;;  %452 = vmatpush.msra.mxu1 %v1074_v39 }
  0x2c   :  { %351 = vmatpush.msrb.mxu3 %v350_v0  ;;  %410 = vmatpush.msra.mxu0 %v1109_v2 }
  0x2d   :  { %270 = vmatpush.msrb.mxu2 %v1128_v19  ;;  %454 = vmatpush.msra.mxu1 %v1090_v55 }
  0x2e   :  { %357 = vmatpush.msrb.mxu3 %v356_v8  ;;  %413 = vmatpush.msra.mxu0 %v1112_v5  ;;  %v1352_v8 = vand.u32 4294901760, %v66_v9 }
  0x2f   :  { %272 = vmatpush.msrb.mxu2 %v1145_v33  ;;  %456 = vmatpush.msra.mxu1 %v1092_v57 }
  0x30   :  { %363 = vmatpush.msrb.mxu3 %v362_v27  ;;  %416 = vmatpush.msra.mxu0 %v1115_v6  ;;  %v1363_v36 = vsub.f32 %v66_v9, %v1352_v8 }
  0x31   :  { %274 = vmatpush.msrb.mxu2 %v1158_v43  ;;  %458 = vmatpush.msra.mxu1 %v1094_v58 }
  0x32   :  { %369 = vmatpush.msrb.mxu3 %v368_v4  ;;  %419 = vmatpush.msra.mxu0 %v1126_v16  ;;  %v1314_v16 = vand.u32 4294901760, %v69_v61 }
  0x33   :  { %276 = vmatpush.msrb.mxu2 %v1168_v47  ;;  %460 = vmatpush.msra.mxu1 %v1096_v59 }
  0x34   :  { %375 = vmatpush.msrb.mxu3 %v374_v37  ;;  %422 = vmatpush.msra.mxu0 %v1137_v24 }
  0x35   :  { %483 = vmatpush.msra.mxu2 %v288_v29  ;;  %462 = vmatpush.msra.mxu1 %v1103_v62  ;;  %v73_v29 = vld [vmem:[#allocation4 + $0x168] sm:$0xff] }
  0x36   :  { %381 = vmatpush.msrb.mxu3 %v380_v38  ;;  %425 = vmatpush.msra.mxu0 %v1154_v41 }
  0x37   :  { %487 = vmatpush.msra.mxu2 %v294_v30  ;;  %464 = vmatpush.msra.mxu1 %v1105_v63 }
  0x38   :  { %550 = vmatpush.msra.mxu3 %v1031_v10  ;;  %428 = vmatpush.msra.mxu0 %v1166_v46  ;;  %v941_v10 = vld [vmem:[#allocation4 + $0x180] ss:$0 sm:$0xff] }
  0x39   :  { %491 = vmatpush.msra.mxu2 %v300_v31  ;;  %466 = vmatpush.msra.mxu1 %v1128_v19  ;;  %v1283_v31 = vand.u32 4294901760, %v75_v25 }
  0x3a   :  { %552 = vmatpush.msra.mxu3 %v1033_v11  ;;  %431 = vmatpush.msra.mxu0 %v1177_v50 }
  0x3b   :  { %495 = vmatpush.msra.mxu2 %v306_v34  ;;  %468 = vmatpush.msra.mxu1 %v1145_v33  ;;  %v1285_v34 = vand.u32 4294901760, %v74_v26 }
  0x3c   :  { %554 = vmatpush.msra.mxu3 %v1035_v12  ;;  %434 = vmatpush.msra.mxu0 %v1187_v56 }
  0x3d   :  { %499 = vmatpush.msra.mxu2 %v312_v35  ;;  %470 = vmatpush.msra.mxu1 %v1158_v43  ;;  %v1287_v35 = vand.u32 4294901760, %v73_v29  ;;  %v1299_v2 = vsub.f32 %v74_v26, %v1285_v34 }
  0x3e   :  { %556 = vmatpush.msra.mxu3 %v1041_v17  ;;  %589 = vmatpush.msrb.mxu0 %v1283_v31 }
  0x3f   :  { %503 = vmatpush.msra.mxu2 %v318_v60  ;;  %472 = vmatpush.msra.mxu1 %v1168_v47  ;;  %v1302_v5 = vsub.f32 %v73_v29, %v1287_v35 }
  0x40   :  { %558 = vmatpush.msra.mxu3 %v1043_v18  ;;  %591 = vmatpush.msrb.mxu0 %v1285_v34 }
  0x41   :  { %507 = vmatpush.msra.mxu2 %v324_v13 }
  0x42   :  { %560 = vmatpush.msra.mxu3 %v1074_v39  ;;  %v72_v39 = vld [vmem:[#allocation4 + $0x160] sm:$0xff]  ;;  %593 = vmatpush.msrb.mxu0 %v1287_v35 }
  0x43   :  { %511 = vmatpush.msra.mxu2 %v330_v14 }
  0x44   :  { %562 = vmatpush.msra.mxu3 %v1090_v55  ;;  %v70_v55 = vld [vmem:[#allocation4 + $0x150] sm:$0xff] }
  0x45   :  { %515 = vmatpush.msra.mxu2 %v336_v15  ;;  %v1293_v60 = vand.u32 4294901760, %v70_v55 }
  0x46   :  { %564 = vmatpush.msra.mxu3 %v1092_v57 }
  0x47   :  { %519 = vmatpush.msra.mxu2 %v342_v32  ;;  %v1312_v15 = vsub.f32 %v70_v55, %v1293_v60  ;;  %v637_v32 = vand.u32 4294901760, %v1299_v2 }
  0x48   :  { %566 = vmatpush.msra.mxu3 %v1094_v58  ;;  %v1289_v58 = vand.u32 4294901760, %v72_v39 }
  0x49   :  { %523 = vmatpush.msra.mxu2 %v348_v40  ;;  %v638_v45 = vsub.f32 %v1299_v2, %v637_v32 }
  0x4a   :  { %568 = vmatpush.msra.mxu3 %v1096_v59  ;;  %v1291_v59 = vand.u32 4294901760, %v71_v54  ;;  %v1306_v13 = vsub.f32 %v72_v39, %v1289_v58  ;;  %595 = vmatpush.msrb.mxu0 %v1289_v58 }
  0x4b   :  { %527 = vmatpush.msra.mxu2 %v354_v42  ;;  %v1323_v42 = vsub.f32 %v69_v61, %v1314_v16  ;;  %v639_v50 = vand.u32 4294901760, %v638_v45 }
  0x4c   :  { %570 = vmatpush.msra.mxu3 %v1103_v62  ;;  %v1309_v14 = vsub.f32 %v71_v54, %v1291_v59  ;;  %v649_v40 = vand.u32 4294901760, %v1306_v13  ;;  %597 = vmatpush.msrb.mxu0 %v1291_v59 }
  0x4d   :  { %531 = vmatpush.msra.mxu2 %v360_v49  ;;  %v667_v56 = vand.u32 4294901760, %v1323_v42 }
  0x4e   :  { %572 = vmatpush.msra.mxu3 %v1105_v63  ;;  %v1296_v63 = vsub.f32 %v75_v25, %v1283_v31  ;;  %v655_v41 = vand.u32 4294901760, %v1309_v14  ;;  %v650_v51 = vsub.f32 %v1306_v13, %v649_v40  ;;  %599 = vmatpush.msrb.mxu0 %v1293_v60 }
  0x4f   :  { %535 = vmatpush.msra.mxu2 %v366_v53 }
  0x50   :  { %574 = vmatpush.msra.mxu3 %v1128_v19  ;;  %v631_v24 = vand.u32 4294901760, %v1296_v63  ;;  %v656_v53 = vsub.f32 %v1309_v14, %v655_v41  ;;  %v651_v27 = vand.u32 4294901760, %v650_v51  ;;  %601 = vmatpush.msrb.mxu0 %v1314_v16 }
  0x51   :  { %539 = vmatpush.msra.mxu2 %v372_v7  ;;  %v1350_v7 = vand.u32 4294901760, %v67_v48 }
  0x52   :  { %576 = vmatpush.msra.mxu3 %v1145_v33  ;;  %v643_v33 = vand.u32 4294901760, %v1302_v5  ;;  %v632_v44 = vsub.f32 %v1296_v63, %v631_v24  ;;  %v657_v38 = vand.u32 4294901760, %v656_v53  ;;  %v61_v53 = vld [vmem:[#allocation4 + $0x108] sm:$0xff] }
  0x53   :  { %543 = vmatpush.msra.mxu2 %v378_v23  ;;  %v1359_v4 = vsub.f32 %v67_v48, %v1350_v7  ;;  %v62_v48 = vld [vmem:[#allocation4 + $0x110] sm:$0xff] }
  0x54   :  { %578 = vmatpush.msra.mxu3 %v1158_v43  ;;  %v68_v43 = vld [vmem:[#allocation4 + $0x140] sm:$0xff]  ;;  %v644_v46 = vsub.f32 %v1302_v5, %v643_v33  ;;  %v633_v49 = vand.u32 4294901760, %v632_v44  ;;  %v1428_v51 = vand.u32 4294901760, %v62_v48 }
  0x55   :  { %v1340_v52 = vand.u32 4294901760, %v68_v43 }
  0x56   :  { %580 = vmatpush.msra.mxu3 %v1168_v47  ;;  %v661_v47 = vand.u32 4294901760, %v1312_v15  ;;  %634 = vmatpush.msrb.mxu1 %v633_v49  ;;  %v645_v0 = vand.u32 4294901760, %v644_v46 }
  0x57   :  { %v1347_v1 = vsub.f32 %v68_v43, %v1340_v52  ;;  %603 = vmatpush.msrb.mxu0 %v1340_v52  ;;  %v63_v43 = vld [vmem:[#allocation4 + $0x118] sm:$0xff] }
  0x58   :  { %v662_v3 = vsub.f32 %v1312_v15, %v661_v47  ;;  %640 = vmatpush.msrb.mxu1 %v639_v50  ;;  %v1416_v46 = vand.u32 4294901760, %v63_v43 }
  0x59   :  { %v673_v28 = vand.u32 4294901760, %v1347_v1  ;;  %605 = vmatpush.msrb.mxu0 %v1350_v7 }
  0x5a   :  { %646 = vmatpush.msrb.mxu1 %v645_v0  ;;  %v1426_v50 = vsub.f32 %v63_v43, %v1416_v46 }
  0x5b   :  { %607 = vmatpush.msrb.mxu0 %v1352_v8 }
  0x5c   :  { %652 = vmatpush.msrb.mxu1 %v651_v27  ;;  %v708_v27 = vsub.f32 %v62_v48, %v1428_v51 }
  0x5e   :  { %658 = vmatpush.msrb.mxu1 %v657_v38  ;;  %v60_v38 = vld [vmem:[#allocation4 + $0x100] sm:$0xff] }
  0x95   :  { %v108_v11 = vpop.f32.mrf.mxu0 }
  0x96   :  { %v109_v12 = vadd.f32 %v941_v10, %v108_v11  ;;  %v165_v18 = vpop.f32.mrf.mxu2  ;;  %v668_v10 = vsub.f32 %v1323_v42, %v667_v56  ;;  %v679_v11 = vand.u32 4294901760, %v1359_v4 }
  0x97   :  { %v139_v17 = vpop.f32.mrf.mxu1  ;;  %v190_v21 = vpop.f32.mrf.mxu3 }
  0x98   :  { %v140_v20 = vadd.f32 %v139_v17, %v109_v12  ;;  %v663_v17 = vand.u32 4294901760, %v662_v3  ;;  %v680_v25 = vsub.f32 %v1359_v4, %v679_v11 }
  0x9a   :  { %v166_v22 = vadd.f32 %v165_v18, %v140_v20  ;;  %v674_v18 = vsub.f32 %v1347_v1, %v673_v28  ;;  %v685_v20 = vand.u32 4294901760, %v1363_v36  ;;  %664 = vmatpush.msrb.mxu1 %v663_v17  ;;  %v681_v54 = vand.u32 4294901760, %v680_v25 }
  0x9b   :  { %v709_v17 = vand.u32 4294901760, %v708_v27 }
  0x9c   :  { %v191_v30 = vadd.f32 %v190_v21, %v166_v22  ;;  %v669_v22 = vand.u32 4294901760, %v668_v10  ;;  %v675_v29 = vand.u32 4294901760, %v674_v18  ;;  %v618_v18 = vand.u32 4294901760, %v60_v38 }
  0x9d   :  { %v217_v57 = vpop.f32.mrf.mxu0  ;;  %v710_v25 = vsub.f32 %v708_v27, %v709_v17 }
  0x9e   :  { %v218_v62 = vadd.f32 %v217_v57, %v191_v30  ;;  %v686_v30 = vsub.f32 %v1363_v36, %v685_v20  ;;  %670 = vmatpush.msrb.mxu1 %v669_v22  ;;  %v65_v57 = vld [vmem:[#allocation4 + $0x128] sm:$0xff] }
  0x9f   :  { %v240_v6 = vpop.f32.mrf.mxu1  ;;  %v1403_v61 = vand.u32 4294901760, %v65_v57 }
  0xa0   :  { %v241_v19 = vadd.f32 %v240_v6, %v218_v62  ;;  %676 = vmatpush.msrb.mxu1 %v675_v29  ;;  %v687_v55 = vand.u32 4294901760, %v686_v30  ;;  %v64_v62 = vld [vmem:[#allocation4 + $0x120] sm:$0xff]  ;;  %v711_v30 = vand.u32 4294901760, %v710_v25 }
  0xa1   :  { %v1406_v6 = vsub.f32 %v65_v57, %v1403_v61  ;;  %609 = vmatpush.msrb.mxu0 %v1403_v61 }
  0xa2   :  { %944 = vtanh.f32 %v241_v19  ;;  %682 = vmatpush.msrb.mxu1 %v681_v54  ;;  %v1408_v19 = vand.u32 4294901760, %v64_v62 }
  0xa3   :  { %v691_v44 = vand.u32 4294901760, %v1406_v6 }
  0xa4   :  { %688 = vmatpush.msrb.mxu1 %v687_v55  ;;  %v1414_v45 = vsub.f32 %v64_v62, %v1408_v19  ;;  %611 = vmatpush.msrb.mxu0 %v1408_v19 }
  0xa5   :  { %v692_v9 = vsub.f32 %v1406_v6, %v691_v44 }
  0xa6   :  { %v697_v49 = vand.u32 4294901760, %v1414_v45  ;;  %613 = vmatpush.msrb.mxu0 %v1416_v46 }
  0xa7   :  { %v693_v0 = vand.u32 4294901760, %v692_v9 }
  0xa8   :  { %v945_v23 = vpop.eup %944  ;;  %v698_v3 = vsub.f32 %v1414_v45, %v697_v49  ;;  %615 = vmatpush.msrb.mxu0 %v1428_v51 }
  0xa9   :  { %v277_v37 = vand.u32 4294901760, %v945_v23  ;;  %694 = vmatpush.msrb.mxu1 %v693_v0 }
  0xaa   :  { %v699_v10 = vand.u32 4294901760, %v698_v3 }
  0xab   :  { %383 = vmatmul.f32.vlgmr.msrb.gmra.mxu3 %v277_v37  ;;  %v278_v12 = vsub.f32 %v945_v23, %v277_v37  ;;  %v703_v23 = vand.u32 4294901760, %v1426_v50 }
  0xac   :  { %785 = vmatpush.msrb.mxu3 %v1283_v31  ;;  %700 = vmatpush.msrb.mxu1 %v699_v10 }
  0xad   :  { %437 = vmatmul.f32.vlgmr.msra.gmra.mxu0 %v278_v12  ;;  %v279_v21 = vand.u32 4294901760, %v278_v12 }
  0xae   :  { %787 = vmatpush.msrb.mxu3 %v1285_v34 }
  0xaf   :  { %476 = vmatmul.f32.vlgmr.msra.gmra.mxu1 %v279_v21  ;;  %v280_v26 = vsub.f32 %v278_v12, %v279_v21  ;;  %v704_v12 = vsub.f32 %v1426_v50, %v703_v23 }
  0xb0   :  { %789 = vmatpush.msrb.mxu3 %v1287_v35 }
  0xb1   :  { %v281_v39 = vand.u32 4294901760, %v280_v26  ;;  %v705_v22 = vand.u32 4294901760, %v704_v12  ;;  %v720_v26 = vsub.f32 %v60_v38, %v618_v18 }
  0xb2   :  { %791 = vmatpush.msrb.mxu3 %v1289_v58 }
  0xb3   :  { %282 = vmatmul.f32.vlgmr.msrb.gmra.mxu2 %v281_v39  ;;  %582 = vmatmul.f32.vlgmr.msra.gmra.mxu3 %v277_v37  ;;  %v721_v39 = vand.u32 4294901760, %v720_v26 }
  0xb4   :  { %732 = vmatpush.msrb.mxu2 %v1296_v63  ;;  %793 = vmatpush.msrb.mxu3 %v1291_v59 }
  0xb5   :  { %706 = vmatpush.msrb.mxu1 %v705_v22  ;;  %v722_v55 = vsub.f32 %v720_v26, %v721_v39 }
  0xb6   :  { %735 = vmatpush.msrb.mxu2 %v1299_v2  ;;  %795 = vmatpush.msrb.mxu3 %v1293_v60 }
  0xb7   :  { %712 = vmatpush.msrb.mxu1 %v711_v30  ;;  %v723_v62 = vand.u32 4294901760, %v722_v55 }
  0xb8   :  { %738 = vmatpush.msrb.mxu2 %v1302_v5  ;;  %797 = vmatpush.msrb.mxu3 %v1314_v16 }
  0xba   :  { %741 = vmatpush.msrb.mxu2 %v1306_v13  ;;  %799 = vmatpush.msrb.mxu3 %v1340_v52 }
  0xbb   :  { %545 = vmatmul.f32.vlgmr.msra.gmra.mxu2 %v277_v37  ;;  %v616_v37 = vand.u32 4294901760, %v61_v53 }
  0xbc   :  { %744 = vmatpush.msrb.mxu2 %v1309_v14  ;;  %801 = vmatpush.msrb.mxu3 %v1350_v7 }
  0xbd   :  { %v714_v21 = vsub.f32 %v61_v53, %v616_v37  ;;  %617 = vmatpush.msrb.mxu0 %v616_v37 }
  0xbe   :  { %747 = vmatpush.msrb.mxu2 %v1312_v15  ;;  %803 = vmatpush.msrb.mxu3 %v1352_v8 }
  0xbf   :  { %v715_v29 = vand.u32 4294901760, %v714_v21  ;;  %619 = vmatpush.msrb.mxu0 %v618_v18 }
  0xc0   :  { %750 = vmatpush.msrb.mxu2 %v1323_v42  ;;  %805 = vmatpush.msrb.mxu3 %v1403_v61 }
  0xc1   :  { %826 = vmatpush.msra.mxu0 %v631_v24  ;;  %v716_v54 = vsub.f32 %v714_v21, %v715_v29 }
  0xc2   :  { %753 = vmatpush.msrb.mxu2 %v1347_v1  ;;  %807 = vmatpush.msrb.mxu3 %v1408_v19 }
  0xc3   :  { %830 = vmatpush.msra.mxu0 %v637_v32  ;;  %v717_v57 = vand.u32 4294901760, %v716_v54 }
  0xc4   :  { %756 = vmatpush.msrb.mxu2 %v1359_v4  ;;  %809 = vmatpush.msrb.mxu3 %v1416_v46 }
  0xc5   :  { %834 = vmatpush.msra.mxu0 %v643_v33  ;;  %718 = vmatpush.msrb.mxu1 %v717_v57 }
  0xc6   :  { %759 = vmatpush.msrb.mxu2 %v1363_v36  ;;  %811 = vmatpush.msrb.mxu3 %v1428_v51 }
  0xc7   :  { %838 = vmatpush.msra.mxu0 %v649_v40  ;;  %724 = vmatpush.msrb.mxu1 %v723_v62 }
  0xc8   :  { %762 = vmatpush.msrb.mxu2 %v1406_v6  ;;  %813 = vmatpush.msrb.mxu3 %v616_v37 }
  0xc9   :  { %893 = vmatpush.msra.mxu1 %v1283_v31  ;;  %842 = vmatpush.msra.mxu0 %v655_v41  ;;  %v942_v31 = vld [vmem:[#allocation4 + $0x188] ss:$0 sm:$0xff] }
  0xca   :  { %765 = vmatpush.msrb.mxu2 %v1414_v45  ;;  %815 = vmatpush.msrb.mxu3 %v618_v18 }
  0xcb   :  { %895 = vmatpush.msra.mxu1 %v1285_v34  ;;  %846 = vmatpush.msra.mxu0 %v661_v47  ;;  %v943_v47 = vld [vmem:[#allocation4 + $0x190] ss:$0 sm:$0xff] }
  0xcc   :  { %768 = vmatpush.msrb.mxu2 %v1426_v50 }
  0xcd   :  { %897 = vmatpush.msra.mxu1 %v1287_v35  ;;  %850 = vmatpush.msra.mxu0 %v667_v56 }
  0xce   :  { %771 = vmatpush.msrb.mxu2 %v708_v27 }
  0xcf   :  { %899 = vmatpush.msra.mxu1 %v1289_v58  ;;  %854 = vmatpush.msra.mxu0 %v673_v28 }
  0xd0   :  { %774 = vmatpush.msrb.mxu2 %v714_v21 }
  0xd1   :  { %901 = vmatpush.msra.mxu1 %v1291_v59  ;;  %858 = vmatpush.msra.mxu0 %v679_v11 }
  0xd2   :  { %777 = vmatpush.msrb.mxu2 %v720_v26 }
  0xd3   :  { %903 = vmatpush.msra.mxu1 %v1293_v60  ;;  %862 = vmatpush.msra.mxu0 %v685_v20 }
  0xd5   :  { %905 = vmatpush.msra.mxu1 %v1314_v16  ;;  %866 = vmatpush.msra.mxu0 %v691_v44 }
  0xd7   :  { %907 = vmatpush.msra.mxu1 %v1340_v52  ;;  %870 = vmatpush.msra.mxu0 %v697_v49 }
  0xd9   :  { %909 = vmatpush.msra.mxu1 %v1350_v7  ;;  %874 = vmatpush.msra.mxu0 %v703_v23 }
  0xdb   :  { %911 = vmatpush.msra.mxu1 %v1352_v8  ;;  %878 = vmatpush.msra.mxu0 %v709_v17 }
  0xdd   :  { %913 = vmatpush.msra.mxu1 %v1403_v61  ;;  %882 = vmatpush.msra.mxu0 %v715_v29 }
  0xdf   :  { %915 = vmatpush.msra.mxu1 %v1408_v19  ;;  %886 = vmatpush.msra.mxu0 %v721_v39 }
  0xe1   :  { %917 = vmatpush.msra.mxu1 %v1416_v46 }
  0xe3   :  { %919 = vmatpush.msra.mxu1 %v1428_v51 }
  0xe5   :  { %921 = vmatpush.msra.mxu1 %v616_v37 }
  0xe7   :  { %923 = vmatpush.msra.mxu1 %v618_v18 }
 0x12a   :  { %v438_v60 = vpop.f32.mrf.mxu0 }
 0x12c   :  { %v477_v2 = vpop.f32.mrf.mxu1 }
 0x12e   :  { %v384_v34 = vpop.f32.mrf.mxu3 }
 0x136   :  { %v283_v35 = vpop.f32.mrf.mxu2  ;;  %v583_v15 = vpop.f32.mrf.mxu3 }
 0x137   :  { %v284_v58 = vadd.f32 %v942_v31, %v283_v35 }
 0x139   :  { %v385_v59 = vadd.f32 %v384_v34, %v284_v58 }
 0x13b   :  { %v439_v63 = vadd.f32 %v438_v60, %v385_v59 }
 0x13d   :  { %v478_v5 = vadd.f32 %v477_v2, %v439_v63 }
 0x13e   :  { %v546_v13 = vpop.f32.mrf.mxu2 }
 0x13f   :  { %v547_v14 = vadd.f32 %v546_v13, %v478_v5 }
 0x141   :  { %v584_v16 = vadd.f32 %v583_v15, %v547_v14 }
 0x143   :  { %946 = vtanh.f32 %v584_v16 }
 0x149   :  { %v947_v24 = vpop.eup %946 }
 0x14a   :  { %v620_v32 = vand.u32 4294901760, %v947_v24 }
 0x14c   :  { %726 = vmatmul.f32.vlgmr.msrb.gmra.mxu1 %v620_v32  ;;  %v621_v33 = vsub.f32 %v947_v24, %v620_v32 }
 0x14e   :  { %780 = vmatmul.f32.vlgmr.msrb.gmra.mxu2 %v621_v33  ;;  %v622_v40 = vand.u32 4294901760, %v621_v33 }
 0x150   :  { %819 = vmatmul.f32.vlgmr.msrb.gmra.mxu3 %v622_v40  ;;  %v623_v41 = vsub.f32 %v621_v33, %v622_v40 }
 0x152   :  { %v624_v42 = vand.u32 4294901760, %v623_v41 }
 0x154   :  { %625 = vmatmul.f32.vlgmr.msrb.gmra.mxu0 %v624_v42  ;;  %925 = vmatmul.f32.vlgmr.msra.gmra.mxu1 %v620_v32 }
 0x15c   :  { %888 = vmatmul.f32.vlgmr.msra.gmra.mxu0 %v620_v32 }
 0x1c9   :  { %v727_v52 = vpop.f32.mrf.mxu1 }
 0x1d1   :  { %v626_v56 = vpop.f32.mrf.mxu0  ;;  %v781_v8 = vpop.f32.mrf.mxu2 }
 0x1d2   :  { %v627_v1 = vadd.f32 %v943_v47, %v626_v56  ;;  %v926_v61 = vpop.f32.mrf.mxu1 }
 0x1d3   :  { %v820_v4 = vpop.f32.mrf.mxu3 }
 0x1d4   :  { %v728_v7 = vadd.f32 %v727_v52, %v627_v1 }
 0x1d6   :  { %v782_v28 = vadd.f32 %v781_v8, %v728_v7 }
 0x1d8   :  { %v821_v36 = vadd.f32 %v820_v4, %v782_v28 }
 0x1d9   :  { %v889_v11 = vpop.f32.mrf.mxu0 }
 0x1da   :  { %v890_v20 = vadd.f32 %v889_v11, %v821_v36 }
 0x1dc   :  { %v927_v6 = vadd.f32 %v926_v61, %v890_v20 }
 0x1de   :  { %930 = vst.msk [vmem:[%s1481_s2] sm:$0xff] %vm929_vm1, %v927_v6 }
 0x1df   :  { %935 = vsyncpa [#allocation3], 1 }
 0x1e0   :  { %936 = vsyncpa [#allocation5], 1 }

</bundles_post_ra>
